<compile_context>
chip_gen: v7x
topology: tpu7x:2x2x1
jax: 0.10.0
libtpu: 0.0.40
codegen_flags: <defaults>
</compile_context>

<pallas_src>
import functools

import jax
import jax.numpy as jnp
from jax import lax
from jax.experimental import pallas as pl
from jax.experimental.pallas import tpu as pltpu


def _round_up(n, m):
    return ((n + m - 1) // m) * m


def _quantilize_kernel(x_ref, o_ref, *, scale, tm, tn, B, D,
                       need_row_mask, need_col_mask):
    x = x_ref[...]                                    # (tm, tn), input dtype
    zero = jnp.zeros((), x.dtype)
    scale_c = jnp.asarray(scale, dtype=x.dtype)

    # sign(0) == 0 in the reference, so x == 0 must contribute exactly 0. The
    # same select also kills the undefined tail values of partial blocks via
    # the row/col validity masks below (only emitted when actually needed).
    keep = x != zero
    if need_row_mask:
        row_lim = B - pl.program_id(0) * tm           # scalar int32
        rows = lax.broadcasted_iota(jnp.int32, (tm, 1), 0)
        keep = jnp.logical_and(keep, rows < row_lim)
    if need_col_mask:
        col_lim = D - pl.program_id(1) * tn
        cols = lax.broadcasted_iota(jnp.int32, (1, tn), 1)
        keep = jnp.logical_and(keep, cols < col_lim)

    # (x - scale*sign(x))^2 == (|x| - scale)^2 for x != 0, and 0 for x == 0.
    diff = jnp.where(keep, jnp.abs(x) - scale_c, zero)
    d32 = diff.astype(jnp.float32)
    sq = d32 * d32

    if tm % 8 == 0:
        # Vreg-wise reduction: sum groups of 8 rows -> (8, tn) f32 partial.
        partial = sq.reshape(tm // 8, 8, tn).sum(axis=0)
    else:
        # Tiny-batch fallback (tm == B < sublane granularity): write the
        # squares directly, output is tiny anyway.
        partial = sq
    o_ref[...] = partial.reshape(o_ref.shape)


def quantilize_loss(x, scale, *, target_block_bytes=2 * 1024 * 1024,
                    max_lanes=1024, input_buffers=2):
    """Pallas implementation of QuantilizeLoss(scale).forward(x) for 2-D x.

    `scale` must be a static Python number (as in the nn.Module, where it is
    fixed at construction time).
    """
    # TODO(synk): a traced/device `scale` would need SMEM scalar prefetch
    # instead of being baked into the kernel closure.
    assert x.ndim == 2
    B, D = x.shape
    itemsize = x.dtype.itemsize
    inv_norm = 1.0 / (2.0 * float(B) * float(D))      # /2 /size(0) /size(1)

    # Lane (last-dim) tile: full D when it fits, otherwise lane-dense multiples
    # of 128 with in-kernel masking of the partial trailing block.
    tn = D if D <= max_lanes else max_lanes
    grid_cols = pl.cdiv(D, tn)
    need_col_mask = (D % tn) != 0

    # Sublane (row) tile: sized by bytes (~target_block_bytes per block) as a
    # multiple of the dtype's sublane packing granularity.
    sub = max(8, 32 // itemsize)
    if B < sub:
        tm = B                                        # full dim (tiny batch)
    else:
        tm_budget = max(sub, (target_block_bytes // (tn * itemsize)) // sub * sub)
        tm = min(tm_budget, _round_up(B, sub))
    grid_rows = pl.cdiv(B, tm)

    # v7x megacore: prefer >= 2 independent blocks so both TensorCores work.
    if grid_rows * grid_cols == 1 and B >= 2 * sub:
        tm = _round_up(pl.cdiv(B, 2), sub)
        grid_rows = pl.cdiv(B, tm)
    need_row_mask = (B % tm) != 0

    s_out = 8 if tm % 8 == 0 else tm                  # per-block partial rows

    kernel = functools.partial(
        _quantilize_kernel, scale=float(scale), tm=tm, tn=tn, B=B, D=D,
        need_row_mask=need_row_mask, need_col_mask=need_col_mask)

    # VMEM budget: double-buffered input blocks + f32 elementwise temps + tiny
    # output blocks. Generous but bounded so it fits v7x's 64 MiB physical VMEM.
    block_bytes = tm * tn * itemsize
    f32_bytes = tm * tn * 4
    vmem_need = input_buffers * block_bytes + 8 * f32_bytes + 2 * 1024 * 1024
    vmem_limit = int(min(40 * 1024 * 1024, max(24 * 1024 * 1024, vmem_need)))

    cost = pl.CostEstimate(
        flops=6 * B * D,
        transcendentals=0,
        bytes_accessed=B * D * itemsize + grid_rows * grid_cols * s_out * tn * 4,
    )

    in_spec_kwargs = {}
    if input_buffers != 2:
        # Optional deeper pipelining sweep (respect VMEM, esp. on v7x).
        in_spec_kwargs["pipeline_mode"] = pl.Buffered(input_buffers)

    partials = pl.pallas_call(
        kernel,
        out_shape=jax.ShapeDtypeStruct((grid_rows, grid_cols, s_out, tn),
                                       jnp.float32),
        grid_spec=pltpu.PrefetchScalarGridSpec(
            num_scalar_prefetch=0,
            grid=(grid_rows, grid_cols),
            in_specs=[pl.BlockSpec((tm, tn), lambda i, j: (i, j),
                                   **in_spec_kwargs)],
            out_specs=pl.BlockSpec((1, 1, s_out, tn),
                                   lambda i, j: (i, j, 0, 0)),
        ),
        compiler_params=pltpu.CompilerParams(
            # Every block writes its own partial -> both axes independent.
            dimension_semantics=("parallel", "parallel"),
            vmem_limit_bytes=vmem_limit,
        ),
        cost_estimate=cost,
    )(x)

    # Tiny per-block partials: single sum + normalization in the wrapper.
    return jnp.sum(partials) * inv_norm


def quantilize_loss_ref(x, scale):
    x = x.astype(jnp.float32)
    binx = scale * jnp.sign(x)
    return jnp.sum((x - binx) ** 2) / 2.0 / x.shape[0] / x.shape[1]


if __name__ == "__main__":
    scale = 0.5

    # Aligned case (no masking emitted).
    x1 = jax.random.normal(jax.random.PRNGKey(0), (8, 256), dtype=jnp.float32)
    loss1 = jax.block_until_ready(quantilize_loss(x1, scale))
    ref1 = quantilize_loss_ref(x1, scale)
    assert jnp.allclose(loss1, ref1, rtol=1e-5, atol=1e-6), (loss1, ref1)

    # Tiny unaligned case (full-dim block, no in-kernel reduce path).
    x2 = jax.random.normal(jax.random.PRNGKey(1), (5, 100), dtype=jnp.float32)
    loss2 = jax.block_until_ready(quantilize_loss(x2, scale))
    ref2 = quantilize_loss_ref(x2, scale)
    assert jnp.allclose(loss2, ref2, rtol=1e-5, atol=1e-6), (loss2, ref2)

    # bf16, unaligned rows, two row blocks (exercises in-kernel row masking
    # and the bf16 VALU path + f32 accumulation).
    x3 = jax.random.normal(jax.random.PRNGKey(2), (37, 300)).astype(jnp.bfloat16)
    loss3 = jax.block_until_ready(quantilize_loss(x3, scale))
    ref3 = quantilize_loss_ref(x3, scale)
    assert jnp.allclose(loss3, ref3, rtol=3e-2, atol=1e-3), (loss3, ref3)

    # Unaligned columns wider than one lane tile (exercises column masking).
    x4 = jax.random.normal(jax.random.PRNGKey(3), (16, 1100), dtype=jnp.float32)
    loss4 = jax.block_until_ready(quantilize_loss(x4, scale))
    ref4 = quantilize_loss_ref(x4, scale)
    assert jnp.allclose(loss4, ref4, rtol=1e-5, atol=1e-6), (loss4, ref4)

    print("KERNEL_OK")
</pallas_src>

<mosaic_0001>
module attributes {stable_mosaic.version = 11 : i64} {
  func.func @_quantilize_kernel(%arg0: i32, %arg1: i32, %arg2: memref<8x256xf32, #tpu.memory_space<vmem>>, %arg3: memref<1x1x8x256xf32, #tpu.memory_space<vmem>>) attributes {dimension_semantics = [#tpu.dimension_semantics<parallel>, #tpu.dimension_semantics<parallel>], iteration_bounds = array<i64: 1, 1>, scalar_prefetch = 0 : i64, scratch_operands = 0 : i64, tpu.core_type = #tpu.core_type<tc>, window_params = [{transform_indices = @transform_0, window_bounds = array<i64: 8, 256>}, {transform_indices = @transform_1, window_bounds = array<i64: 1, 1, 8, 256>}]} {
    %c0 = arith.constant 0 : index
    %c0_0 = arith.constant 0 : index
    %0 = vector.load %arg2[%c0, %c0_0] : memref<8x256xf32, #tpu.memory_space<vmem>>, vector<8x256xf32>
    %cst = arith.constant 0.000000e+00 : f32
    %1 = vector.broadcast %cst : f32 to vector<8x256xf32>
    %2 = arith.cmpf one, %0, %1 : vector<8x256xf32>
    %3 = math.absf %0 : vector<8x256xf32>
    %cst_1 = arith.constant 5.000000e-01 : f32
    %4 = vector.broadcast %cst_1 : f32 to vector<8x256xf32>
    %5 = arith.subf %3, %4 : vector<8x256xf32>
    %cst_2 = arith.constant 0.000000e+00 : f32
    %6 = vector.broadcast %cst_2 : f32 to vector<8x256xf32>
    %7 = arith.select %2, %5, %6 : vector<8x256xi1>, vector<8x256xf32>
    %8 = arith.mulf %7, %7 : vector<8x256xf32>
    %9 = vector.shape_cast %8 : vector<8x256xf32> to vector<1x8x256xf32>
    %cst_3 = arith.constant dense<0.000000e+00> : vector<8x256xf32>
    %10 = vector.multi_reduction <add>, %9, %cst_3 [0] : vector<1x8x256xf32> to vector<8x256xf32>
    %11 = vector.shape_cast %10 : vector<8x256xf32> to vector<1x1x8x256xf32>
    %c0_4 = arith.constant 0 : index
    %c0_5 = arith.constant 0 : index
    %c0_6 = arith.constant 0 : index
    %c0_7 = arith.constant 0 : index
    %12 = vector.load %arg3[%c0_4, %c0_5, %c0_6, %c0_7] : memref<1x1x8x256xf32, #tpu.memory_space<vmem>>, vector<1x1x8x256xf32>
    tpu.vector_store %arg3[%c0_4, %c0_5, %c0_6, %c0_7], %11 {strides = array<i32>} : memref<1x1x8x256xf32, #tpu.memory_space<vmem>>, vector<1x1x8x256xf32>,
    return
  }
  func.func @transform_0(%arg0: i32, %arg1: i32) -> (i32, i32) {
    %c0_i32 = arith.constant 0 : i32
    return %arg0, %arg1 : i32, i32
  }
  func.func @transform_1(%arg0: i32, %arg1: i32) -> (i32, i32, i32, i32) {
    %c0_i32 = arith.constant 0 : i32
    %c0_i32_0 = arith.constant 0 : i32
    %c0_i32_1 = arith.constant 0 : i32
    return %arg0, %arg1, %c0_i32, %c0_i32_0 : i32, i32, i32, i32
  }
}

</mosaic_0001>

<bundles_post_ra>
// kernel: tpu_custom_call.1
= control target key start
LH: loop header
LB: loop body
LE: loop exit
PB: predicated region body
PF: predicated region fallthrough
CT: control target
= control target key end

     0   :  { %6 = vsyncpa [#allocation3], 0  ;;  %s140_s0 = inlined_call_operand.hbm [shape: f32[8,256], index: 0, kind: input, shape index: {}]   ;;  %s141_s1 = inlined_call_operand.hbm [shape: f32[1,1,8,256], index: 1, kind: output, shape index: {}]  }
   0x1   :  { %7 = vsyncpa [#allocation4], 0  ;;  %s104_s6 = smov [#allocation2]   ;;  %s56_s10 = scalar_lea.hbm %s140_s0, 256 }
   0x2   :  { %s14_s7 = sshll.u32 %s104_s6, 4  ;;  %p57_p0 = scmp.ne.s32.totalorder %s140_s0, %s56_s10  ;;  %s15_s7 = int_to_ptr.vmem [resolvable:$true] %s14_s7 }
   0x3   :  { %p60_p1 = scmp.lt.u32.totalorder %s56_s10, %s140_s0 }
   0x5   :  { %p62_p2 = pnand %p60_p1, %p57_p0 }
   0x7   :  { %65 = shalt.err (!%p62_p2)
}
   0x8   :  { %s66_s15 = scalar_lea.vmem %s15_s7, 256  ;;  %p71_p4 = scmp.lt.s32.totalorder %s15_s7, %s15_s7 }
   0x9   :  { %p67_p3 = scmp.ne.s32.totalorder %s15_s7, %s66_s15  ;;  %p72_p5 = scmp.lt.s32.totalorder %s66_s15, %s66_s15 }
   0xb   :  { %p73_p6 = por %p72_p5, %p71_p4 }
   0xd   :  { %p74_p7 = pnand %p73_p6, %p67_p3 }
   0xf   :  { %77 = shalt.err (!%p74_p7)
}
  0x10   :  { %17 = dma.hbm_to_vmem [thread:$0]  %s140_s0, 256, %s15_s7, [#allocation3]  }
  0x11   :  { %100 = dma.done.wait [#allocation3], 256  }
  0x12   :  { %101 = vsyncadd [#allocation3], 4294967040  ;;  %v21_v0 = vld [vmem:[#allocation2] sm:$0xff]  ;;  %v22_v1 = vld [vmem:[#allocation2 + $0x8] sm:$0xff]  ;;  %s105_s18 = smov [#allocation5]  }
  0x13   :  { %v25_v2 = vand.u32 2147483647, %v21_v0  ;;  %v26_v3 = vand.u32 2147483647, %v22_v1  ;;  %vm23_vm0 = vcmp.ne.f32.partialorder %v21_v0, 0.0  ;;  %vm24_vm1 = vcmp.ne.f32.partialorder %v22_v1, 0.0 }
  0x14   :  { %s43_s19 = sshll.u32 %s105_s18, 4  ;;  %s44_s19 = int_to_ptr.vmem [resolvable:$true] %s43_s19 }
  0x15   :  { %v52_v4 = vadd.f32 -0.5, %v25_v2  ;;  %v53_v5 = vadd.f32 -0.5, %v26_v3  ;;  %s78_s0 = scalar_lea.vmem %s44_s19, 256  ;;  %p83_p9 = scmp.lt.s32.totalorder %s44_s19, %s44_s19 }
  0x16   :  { %p79_p8 = scmp.ne.s32.totalorder %s44_s19, %s78_s0  ;;  %p84_p10 = scmp.lt.s32.totalorder %s78_s0, %s78_s0 }
  0x17   :  { %v29_v6 = vsel %vm23_vm0, %v52_v4, 0.0  ;;  %v30_v7 = vsel %vm24_vm1, %v53_v5, 0.0 }
  0x18   :  { %v31_v8 = vmul.f32 %v29_v6, %v29_v6  ;;  %v32_v9 = vmul.f32 %v30_v7, %v30_v7  ;;  %p85_p11 = por %p84_p10, %p83_p9 }
  0x1a   :  { %35 = vst [vmem:[#allocation5] sm:$0xff] %v31_v8  ;;  %36 = vst [vmem:[#allocation5 + $0x8] sm:$0xff] %v32_v9  ;;  %p86_p12 = pnand %p85_p11, %p79_p8 }
  0x1c   :  { %89 = shalt.err (!%p86_p12)
}
  0x1d   :  { %s90_s22 = scalar_lea.hbm %s141_s1, 256 }
  0x1e   :  { %p91_p13 = scmp.ne.s32.totalorder %s141_s1, %s90_s22  ;;  %p94_p0 = scmp.lt.u32.totalorder %s90_s22, %s141_s1 }
  0x20   :  { %p96_p1 = pnand %p94_p0, %p91_p13 }
  0x22   :  { %99 = shalt.err (!%p96_p1)
}
  0x23   :  { %46 = dma.vmem_to_hbm [thread:$0]  %s44_s19, 256, %s141_s1, [#allocation4]  }
  0x24   :  { %102 = dma.done.wait [#allocation4], 256  }
  0x25   :  { %103 = vsyncadd [#allocation4], 4294967040 }
  0x26   :  { %50 = vsyncpa [#allocation3], 1 }
  0x27   :  { %51 = vsyncpa [#allocation4], 1 }

</bundles_post_ra>
